<compile_context>
chip_gen: v7x
topology: tpu7x:2x2x1
jax: 0.10.0
libtpu: 0.0.40
codegen_flags: <defaults>
</compile_context>

<pallas_src>
import functools
from typing import NamedTuple

import jax
import jax.numpy as jnp
from jax.experimental import pallas as pl
from jax.experimental.pallas import tpu as pltpu


def _round_up(x, m):
    return ((x + m - 1) // m) * m


def _tensorcores_per_device():
    """TensorCores per JAX device (v7x: 2, v5e/v6e: 1). Conservative fallback 1."""
    try:
        dev = jax.devices()[0]
        n = getattr(dev, "num_cores", None)
        if isinstance(n, int) and n > 0:
            return max(1, min(int(n), 2))
        kind = str(getattr(dev, "device_kind", "")).lower()
        if "v7" in kind:
            return 2
    except Exception:
        pass
    return 1


def _choose_batch_tiling(batch, num_cores, max_rows_per_step=2048):
    """Rows-per-grid-step and padded batch: one step per TensorCore, minimal
    8-row padding; more steps only if a step would exceed max_rows_per_step."""
    b8 = _round_up(max(batch, 1), 8)
    steps = max(1, min(num_cores, b8 // 8))
    if b8 > steps * max_rows_per_step:
        steps = _round_up(pl.cdiv(b8, max_rows_per_step), num_cores)
    tb = _round_up(pl.cdiv(batch, steps), 8)
    return tb, steps * tb


class ActorParams(NamedTuple):
    """Kernel-ready (pre-padded, pre-cast) Actor parameters."""
    w1: jax.Array        # (S, H1)      compute dtype
    b1: jax.Array        # (1, H1)      f32
    w2: jax.Array        # (H1, H2)     compute dtype
    b2: jax.Array        # (1, H2)      f32
    wm_pad: jax.Array    # (H2, A_pad)  compute dtype, action dim padded to 128
    bm_pad: jax.Array    # (1, A_pad)   f32
    std_row: jax.Array   # (1, A)       f32, exp(clip(log_std, -20, 2))


def _actor_kernel(x_ref, w1_ref, b1_ref, w2_ref, b2_ref, wm_ref, bm_ref,
                  mean_ref, *, use_tanh):
    act = jnp.tanh if use_tanh else (lambda v: jnp.maximum(v, 0.0))
    cd = w1_ref.dtype                       # MXU compute dtype (bf16 or f32)

    x = x_ref[...].astype(cd)                                     # (TB, S)

    # fc1 + activation (f32 accumulation, f32 elementwise)
    h1 = jnp.dot(x, w1_ref[...], preferred_element_type=jnp.float32)
    h1 = act(h1 + b1_ref[...])                                    # (TB, H1) f32

    # fc2 + activation
    h2 = jnp.dot(h1.astype(cd), w2_ref[...], preferred_element_type=jnp.float32)
    h2 = act(h2 + b2_ref[...])                                    # (TB, H2) f32

    # mean head + tanh (action dim padded to 128 lanes -> unmasked stores)
    m = jnp.dot(h2.astype(cd), wm_ref[...], preferred_element_type=jnp.float32)
    mean_ref[...] = jnp.tanh(m + bm_ref[...]).astype(mean_ref.dtype)


def prepare_actor_params(params, *, compute_dtype=jnp.bfloat16):
    """One-time param prep: pad mean head to 128 lanes, cast weights to the
    MXU compute dtype, precompute std row. Do this once per parameter update,
    NOT per forward call."""
    w1, b1, w2, b2, wm, bm, log_std = params
    A = wm.shape[1]
    A_pad = _round_up(A, 128)
    wm_p = jnp.pad(wm, ((0, 0), (0, A_pad - A)))
    bm_p = jnp.pad(bm, ((0, 0), (0, A_pad - A)))
    std_row = jnp.exp(jnp.clip(log_std, -20.0, 2.0)).astype(jnp.float32)
    cd = compute_dtype
    return ActorParams(
        w1=w1.astype(cd), b1=b1.astype(jnp.float32),
        w2=w2.astype(cd), b2=b2.astype(jnp.float32),
        wm_pad=wm_p.astype(cd), bm_pad=bm_p.astype(jnp.float32),
        std_row=std_row)


def actor_forward(state, p: ActorParams, *, use_tanh, num_tensorcores=None):
    """Fused Actor forward. Returns (mean, std), both (B, action_dim) f32.

    Note: for tiny batches (B <~ 8) a plain-XLA path (see `_reference`) can
    match this kernel since everything is launch-overhead-bound; callers may
    dispatch on B if they care.
    """
    B, S = state.shape
    A = p.std_row.shape[1]
    A_pad = p.wm_pad.shape[1]

    cores = num_tensorcores if num_tensorcores else _tensorcores_per_device()
    TB, B_pad = _choose_batch_tiling(B, cores)

    x = state if B_pad == B else jnp.pad(state, ((0, B_pad - B), (0, 0)))

    kernel = functools.partial(_actor_kernel, use_tanh=use_tanh)

    # Weights/biases: constant index_map -> DMA'd once, VMEM-resident.
    def resident(arr):
        return pl.BlockSpec(arr.shape, lambda i: (0, 0), memory_space=pltpu.VMEM)

    mean_pad = pl.pallas_call(
        kernel,
        out_shape=jax.ShapeDtypeStruct((B_pad, A_pad), jnp.float32),
        grid=(B_pad // TB,),
        in_specs=[
            pl.BlockSpec((TB, S), lambda i: (i, 0), memory_space=pltpu.VMEM),
            resident(p.w1), resident(p.b1),
            resident(p.w2), resident(p.b2),
            resident(p.wm_pad), resident(p.bm_pad),
        ],
        out_specs=pl.BlockSpec((TB, A_pad), lambda i: (i, 0),
                               memory_space=pltpu.VMEM),
        compiler_params=pltpu.CompilerParams(
            dimension_semantics=("parallel",)),
    )(x, p.w1, p.b1, p.w2, p.b2, p.wm_pad, p.bm_pad)

    mean = mean_pad[:B, :A]
    std = jnp.broadcast_to(p.std_row, mean.shape)
    return mean, std


def init_actor_params(key, state_dim, action_dim, hidden_1=128, hidden_2=128):
    """Deterministic synthetic init (PyTorch-Linear-like uniform fan-in bounds)."""
    ks = jax.random.split(key, 6)

    def linear(kw, kb, fan_in, fan_out):
        bound = 1.0 / jnp.sqrt(fan_in)
        w = jax.random.uniform(kw, (fan_in, fan_out), jnp.float32, -bound, bound)
        b = jax.random.uniform(kb, (1, fan_out), jnp.float32, -bound, bound)
        return w, b

    w1, b1 = linear(ks[0], ks[1], state_dim, hidden_1)
    w2, b2 = linear(ks[2], ks[3], hidden_1, hidden_2)
    wm, bm = linear(ks[4], ks[5], hidden_2, action_dim)
    log_std = jnp.zeros((1, action_dim), jnp.float32)   # nn.Parameter(torch.zeros(1, A))
    return (w1, b1, w2, b2, wm, bm, log_std)


def _reference(state, params, use_tanh):
    """Pure-JAX f32 reference of the PyTorch forward."""
    w1, b1, w2, b2, wm, bm, log_std = params
    act = jnp.tanh if use_tanh else jax.nn.relu
    h = act(state @ w1 + b1)
    h = act(h @ w2 + b2)
    mean = jnp.tanh(h @ wm + bm)
    std = jnp.broadcast_to(jnp.exp(jnp.clip(log_std, -20.0, 2.0)), mean.shape)
    return mean, std


if __name__ == "__main__":
    key = jax.random.PRNGKey(0)
    k_params, k_state_small, k_state_big = jax.random.split(key, 3)

    state_dim = 32
    action_dim = 8
    hidden_1 = 128
    hidden_2 = 128
    tricks = {"tanh_activation_function": True}
    use_tanh = tricks["tanh_activation_function"]

    raw_params = init_actor_params(k_params, state_dim, action_dim, hidden_1, hidden_2)

    # ---- default bf16 MXU path ------------------------------------------------
    p_bf16 = prepare_actor_params(raw_params, compute_dtype=jnp.bfloat16)
    fwd = jax.jit(functools.partial(actor_forward, use_tanh=use_tanh))

    # Small (module-spec) batch.
    state_small = jax.random.normal(k_state_small, (2, state_dim), jnp.float32)
    mean, std = fwd(state_small, p_bf16)
    jax.block_until_ready((mean, std))
    mean_ref, std_ref = _reference(state_small, raw_params, use_tanh)
    assert mean.shape == (2, action_dim) and std.shape == (2, action_dim)
    assert jnp.allclose(mean, mean_ref, atol=5e-2), "mean mismatch (B=2, bf16)"
    assert jnp.allclose(std, std_ref, atol=1e-6), "std mismatch (B=2)"

    # Larger, non-tile-aligned batch exercising the grid + padding path.
    state_big = jax.random.normal(k_state_big, (260, state_dim), jnp.float32)
    mean_b, std_b = fwd(state_big, p_bf16)
    jax.block_until_ready((mean_b, std_b))
    mean_b_ref, std_b_ref = _reference(state_big, raw_params, use_tanh)
    assert jnp.allclose(mean_b, mean_b_ref, atol=5e-2), "mean mismatch (B=260, bf16)"
    assert jnp.allclose(std_b, std_b_ref, atol=1e-6), "std mismatch (B=260)"

    # ---- f32 MXU path (tight numerics check) ----------------------------------
    p_f32 = prepare_actor_params(raw_params, compute_dtype=jnp.float32)
    mean_f, std_f = actor_forward(state_big, p_f32, use_tanh=use_tanh)
    jax.block_until_ready((mean_f, std_f))
    assert jnp.allclose(mean_f, mean_b_ref, atol=1e-4), "mean mismatch (B=260, f32)"
    assert jnp.allclose(std_f, std_b_ref, atol=1e-6), "std mismatch (B=260, f32)"

    # ReLU activation variant sanity check.
    mean_r, _ = actor_forward(state_small, p_f32, use_tanh=False)
    jax.block_until_ready(mean_r)
    mean_r_ref, _ = _reference(state_small, raw_params, False)
    assert jnp.allclose(mean_r, mean_r_ref, atol=1e-4), "mean mismatch (relu)"

    print("KERNEL_OK")
</pallas_src>

<mosaic_0001>
module attributes {stable_mosaic.version = 11 : i64} {
  func.func @_actor_kernel(%arg0: i32, %arg1: memref<8x32xf32, #tpu.memory_space<vmem>>, %arg2: memref<32x128xbf16, #tpu.memory_space<vmem>>, %arg3: memref<1x128xf32, #tpu.memory_space<vmem>>, %arg4: memref<128x128xbf16, #tpu.memory_space<vmem>>, %arg5: memref<1x128xf32, #tpu.memory_space<vmem>>, %arg6: memref<128x128xbf16, #tpu.memory_space<vmem>>, %arg7: memref<1x128xf32, #tpu.memory_space<vmem>>, %arg8: memref<8x128xf32, #tpu.memory_space<vmem>>) attributes {dimension_semantics = [#tpu.dimension_semantics<parallel>], iteration_bounds = array<i64: 1>, scalar_prefetch = 0 : i64, scratch_operands = 0 : i64, tpu.core_type = #tpu.core_type<tc>, window_params = [{transform_indices = @transform_0, window_bounds = array<i64: 8, 32>}, {pipeline_mode = #tpu.pipeline_mode<synchronous>, transform_indices = @transform_1, window_bounds = array<i64: 32, 128>}, {pipeline_mode = #tpu.pipeline_mode<synchronous>, transform_indices = @transform_2, window_bounds = array<i64: 1, 128>}, {pipeline_mode = #tpu.pipeline_mode<synchronous>, transform_indices = @transform_3, window_bounds = array<i64: 128, 128>}, {pipeline_mode = #tpu.pipeline_mode<synchronous>, transform_indices = @transform_4, window_bounds = array<i64: 1, 128>}, {pipeline_mode = #tpu.pipeline_mode<synchronous>, transform_indices = @transform_5, window_bounds = array<i64: 128, 128>}, {pipeline_mode = #tpu.pipeline_mode<synchronous>, transform_indices = @transform_6, window_bounds = array<i64: 1, 128>}, {transform_indices = @transform_7, window_bounds = array<i64: 8, 128>}]} {
    %c0 = arith.constant 0 : index
    %c0_0 = arith.constant 0 : index
    %0 = vector.load %arg1[%c0, %c0_0] : memref<8x32xf32, #tpu.memory_space<vmem>>, vector<8x32xf32>
    %1 = arith.truncf %0 : vector<8x32xf32> to vector<8x32xbf16>
    %c0_1 = arith.constant 0 : index
    %c0_2 = arith.constant 0 : index
    %2 = vector.load %arg2[%c0_1, %c0_2] : memref<32x128xbf16, #tpu.memory_space<vmem>>, vector<32x128xbf16>
    %cst = arith.constant dense<0.000000e+00> : vector<8x128xf32>
    %3 = tpu.matmul %1, %2, %cst {dimension_numbers = #tpu.dot_dimension_numbers<[1], [0], [0], [1], [0, 0, 1, 1], [], []>} : vector<8x32xbf16>, vector<32x128xbf16>, vector<8x128xf32> -> vector<8x128xf32>
    %c0_3 = arith.constant 0 : index
    %c0_4 = arith.constant 0 : index
    %4 = vector.load %arg3[%c0_3, %c0_4] : memref<1x128xf32, #tpu.memory_space<vmem>>, vector<1x128xf32>
    %5 = vector.broadcast %4 : vector<1x128xf32> to vector<8x128xf32>
    %6 = arith.addf %3, %5 : vector<8x128xf32>
    %7 = math.tanh %6 : vector<8x128xf32>
    %8 = arith.truncf %7 : vector<8x128xf32> to vector<8x128xbf16>
    %c0_5 = arith.constant 0 : index
    %c0_6 = arith.constant 0 : index
    %9 = vector.load %arg4[%c0_5, %c0_6] : memref<128x128xbf16, #tpu.memory_space<vmem>>, vector<128x128xbf16>
    %cst_7 = arith.constant dense<0.000000e+00> : vector<8x128xf32>
    %10 = tpu.matmul %8, %9, %cst_7 {dimension_numbers = #tpu.dot_dimension_numbers<[1], [0], [0], [1], [0, 0, 1, 1], [], []>} : vector<8x128xbf16>, vector<128x128xbf16>, vector<8x128xf32> -> vector<8x128xf32>
    %c0_8 = arith.constant 0 : index
    %c0_9 = arith.constant 0 : index
    %11 = vector.load %arg5[%c0_8, %c0_9] : memref<1x128xf32, #tpu.memory_space<vmem>>, vector<1x128xf32>
    %12 = vector.broadcast %11 : vector<1x128xf32> to vector<8x128xf32>
    %13 = arith.addf %10, %12 : vector<8x128xf32>
    %14 = math.tanh %13 : vector<8x128xf32>
    %15 = arith.truncf %14 : vector<8x128xf32> to vector<8x128xbf16>
    %c0_10 = arith.constant 0 : index
    %c0_11 = arith.constant 0 : index
    %16 = vector.load %arg6[%c0_10, %c0_11] : memref<128x128xbf16, #tpu.memory_space<vmem>>, vector<128x128xbf16>
    %cst_12 = arith.constant dense<0.000000e+00> : vector<8x128xf32>
    %17 = tpu.matmul %15, %16, %cst_12 {dimension_numbers = #tpu.dot_dimension_numbers<[1], [0], [0], [1], [0, 0, 1, 1], [], []>} : vector<8x128xbf16>, vector<128x128xbf16>, vector<8x128xf32> -> vector<8x128xf32>
    %c0_13 = arith.constant 0 : index
    %c0_14 = arith.constant 0 : index
    %18 = vector.load %arg7[%c0_13, %c0_14] : memref<1x128xf32, #tpu.memory_space<vmem>>, vector<1x128xf32>
    %19 = vector.broadcast %18 : vector<1x128xf32> to vector<8x128xf32>
    %20 = arith.addf %17, %19 : vector<8x128xf32>
    %21 = math.tanh %20 : vector<8x128xf32>
    %c0_15 = arith.constant 0 : index
    %c0_16 = arith.constant 0 : index
    %22 = vector.load %arg8[%c0_15, %c0_16] : memref<8x128xf32, #tpu.memory_space<vmem>>, vector<8x128xf32>
    tpu.vector_store %arg8[%c0_15, %c0_16], %21 {strides = array<i32>} : memref<8x128xf32, #tpu.memory_space<vmem>>, vector<8x128xf32>,
    return
  }
  func.func @transform_0(%arg0: i32) -> (i32, i32) {
    %c0_i32 = arith.constant 0 : i32
    %c0_i32_0 = arith.constant 0 : i32
    return %arg0, %c0_i32 : i32, i32
  }
  func.func @transform_1(%arg0: i32) -> (i32, i32) {
    %c0_i32 = arith.constant 0 : i32
    %c0_i32_0 = arith.constant 0 : i32
    %c0_i32_1 = arith.constant 0 : i32
    return %c0_i32, %c0_i32_0 : i32, i32
  }
  func.func @transform_2(%arg0: i32) -> (i32, i32) {
    %c0_i32 = arith.constant 0 : i32
    %c0_i32_0 = arith.constant 0 : i32
    %c0_i32_1 = arith.constant 0 : i32
    return %c0_i32, %c0_i32_0 : i32, i32
  }
  func.func @transform_3(%arg0: i32) -> (i32, i32) {
    %c0_i32 = arith.constant 0 : i32
    %c0_i32_0 = arith.constant 0 : i32
    %c0_i32_1 = arith.constant 0 : i32
    return %c0_i32, %c0_i32_0 : i32, i32
  }
  func.func @transform_4(%arg0: i32) -> (i32, i32) {
    %c0_i32 = arith.constant 0 : i32
    %c0_i32_0 = arith.constant 0 : i32
    %c0_i32_1 = arith.constant 0 : i32
    return %c0_i32, %c0_i32_0 : i32, i32
  }
  func.func @transform_5(%arg0: i32) -> (i32, i32) {
    %c0_i32 = arith.constant 0 : i32
    %c0_i32_0 = arith.constant 0 : i32
    %c0_i32_1 = arith.constant 0 : i32
    return %c0_i32, %c0_i32_0 : i32, i32
  }
  func.func @transform_6(%arg0: i32) -> (i32, i32) {
    %c0_i32 = arith.constant 0 : i32
    %c0_i32_0 = arith.constant 0 : i32
    %c0_i32_1 = arith.constant 0 : i32
    return %c0_i32, %c0_i32_0 : i32, i32
  }
  func.func @transform_7(%arg0: i32) -> (i32, i32) {
    %c0_i32 = arith.constant 0 : i32
    %c0_i32_0 = arith.constant 0 : i32
    return %arg0, %c0_i32 : i32, i32
  }
}

</mosaic_0001>

<bundles_post_ra>
// kernel: actor_forward.1
= control target key start
LH: loop header
LB: loop body
LE: loop exit
PB: predicated region body
PF: predicated region fallthrough
CT: control target
= control target key end

     0   :  { %12 = vsyncpa [#allocation3], 0  ;;  %s642_s0 = inlined_call_operand.vmem [shape: f32[8,32], index: 0, kind: input, shape index: {}]   ;;  %s643_s1 = inlined_call_operand.vmem [shape: bf16[32,128], index: 1, kind: input, shape index: {}]   ;;  %s644_s2 = inlined_call_operand.vmem [shape: f32[1,128], index: 2, kind: input, shape index: {}]   ;;  %s645_s3 = inlined_call_operand.hbm [shape: bf16[128,128], index: 3, kind: input, shape index: {}]   ;;  %s646_s4 = inlined_call_operand.vmem [shape: f32[1,128], index: 4, kind: input, shape index: {}]   ;;  %s647_s5 = inlined_call_operand.hbm [shape: bf16[128,128], index: 5, kind: input, shape index: {}]   ;;  %s648_s6 = inlined_call_operand.vmem [shape: f32[1,128], index: 6, kind: input, shape index: {}]   ;;  %s649_s7 = inlined_call_operand.vmem [shape: f32[8,128], index: 7, kind: output, shape index: {}]  }
   0x1   :  { %13 = vsyncpa [#allocation5], 0  ;;  %s527_s24 = smov [#allocation2]   ;;  %s479_s28 = scalar_lea.hbm %s645_s3, 1024 }
   0x2   :  { %s25_s25 = sshll.u32 %s527_s24, 4  ;;  %p480_p0 = scmp.ne.s32.totalorder %s645_s3, %s479_s28  ;;  %s26_s25 = int_to_ptr.vmem [resolvable:$true] %s25_s25 }
   0x3   :  { %p483_p1 = scmp.lt.u32.totalorder %s479_s28, %s645_s3 }
   0x5   :  { %p485_p2 = pnand %p483_p1, %p480_p0 }
   0x7   :  { %488 = shalt.err (!%p485_p2)
}
   0x8   :  { %s489_s10 = scalar_lea.vmem %s26_s25, 1024  ;;  %p494_p4 = scmp.lt.s32.totalorder %s26_s25, %s26_s25 }
   0x9   :  { %p490_p3 = scmp.ne.s32.totalorder %s26_s25, %s489_s10  ;;  %p495_p5 = scmp.lt.s32.totalorder %s489_s10, %s489_s10 }
   0xb   :  { %p496_p6 = por %p495_p5, %p494_p4 }
   0xd   :  { %p497_p7 = pnand %p496_p6, %p490_p3 }
   0xf   :  { %500 = shalt.err (!%p497_p7)
}
  0x10   :  { %s528_s11 = smov 64   ;;  %s529_s12 = smov 4  }
  0x11   :  { %31 = dma.hbm_to_vmem [thread:$0]  %s645_s3, 1024, %s26_s25, [#allocation3], %s528_s11, %s528_s11, %s529_s12  }
  0x12   :  { %s530_s15 = smov [#allocation4]   ;;  %s501_s19 = scalar_lea.hbm %s647_s5, 1024 }
  0x13   :  { %s39_s16 = sshll.u32 %s530_s15, 4  ;;  %p502_p8 = scmp.ne.s32.totalorder %s647_s5, %s501_s19  ;;  %s40_s16 = int_to_ptr.vmem [resolvable:$true] %s39_s16 }
  0x14   :  { %p505_p9 = scmp.lt.u32.totalorder %s501_s19, %s647_s5 }
  0x16   :  { %p507_p10 = pnand %p505_p9, %p502_p8 }
  0x18   :  { %510 = shalt.err (!%p507_p10)
}
  0x19   :  { %s511_s24 = scalar_lea.vmem %s40_s16, 1024  ;;  %p516_p12 = scmp.lt.s32.totalorder %s40_s16, %s40_s16 }
  0x1a   :  { %p512_p11 = scmp.ne.s32.totalorder %s40_s16, %s511_s24  ;;  %p517_p13 = scmp.lt.s32.totalorder %s511_s24, %s511_s24 }
  0x1c   :  { %p518_p0 = por %p517_p13, %p516_p12 }
  0x1e   :  { %p519_p1 = pnand %p518_p0, %p512_p11 }
  0x20   :  { %522 = shalt.err (!%p519_p1)
}
  0x21   :  { %45 = dma.hbm_to_vmem [thread:$0]  %s647_s5, 1024, %s40_s16, [#allocation5], %s528_s11, %s528_s11, %s529_s12  }
  0x22   :  { %523 = dma.done.wait [#allocation3], 1024  }
  0x23   :  { %524 = vsyncadd [#allocation3], 4294966272 }
  0x24   :  { %525 = dma.done.wait [#allocation5], 1024  }
  0x25   :  { %526 = vsyncadd [#allocation5], 4294966272  ;;  %v531_v0 = vmov 0.0   ;;  %vm532_vm0 = vmmov 0   ;;  %v455_v1 = vld [vmem:[%s643_s1] sm:$0xff]   ;;  %v456_v2 = vld [vmem:[%s643_s1 + $0x8] sm:$0xff]  }
  0x26   :  { %401 = vmatprep.subr.bf16.mxu0 %v531_v0  ;;  %405 = vmatprep.mubr.msk.bf16.mxu0 %vm532_vm0, %v531_v0  ;;  %v55_v3 = vld [vmem:[%s642_s0] sm:$0xff]  ;;  %v458_v6 = vld [vmem:[#allocation2 + $0x8] sm:$0xff]   ;;  %vm80_vm1 = vcmask 261120   ;;  %v459_v7 = vld [vmem:[#allocation2 + $0x10] sm:$0xff]  }
  0x27   :  { %409 = vmatprep.subr.bf16.mxu1 %v531_v0  ;;  %425 = vmatprep.mubr.msk.bf16.mxu1 %vm532_vm0, %v531_v0  ;;  %v457_v4 = vld [vmem:[#allocation2] sm:$0xff]   ;;  %v56_v5 = vpack.c.bf16 %v55_v3, %v55_v3  ;;  %v460_v8 = vld [vmem:[#allocation2 + $0x18] sm:$0xff]   ;;  %v462_v10 = vld [vmem:[#allocation2 + $0x28] sm:$0xff]  }
  0x28   :  { %402 = vmatpush3.bf16.msra.mxu0 %v455_v1  ;;  %410 = vmatpush3.bf16.msra.mxu1 %v457_v4  ;;  %v461_v9 = vld [vmem:[#allocation2 + $0x20] sm:$0xff]   ;;  %v463_v11 = vld [vmem:[#allocation2 + $0x30] sm:$0xff]   ;;  %v464_v12 = vld [vmem:[#allocation2 + $0x38] sm:$0xff]  }
  0x29   :  { %403 = vmatprep.subr.bf16.mxu0 %v531_v0  ;;  %411 = vmatprep.subr.bf16.mxu1 %v531_v0  ;;  %v465_v13 = vld [vmem:[#allocation4] sm:$0xff]   ;;  %v466_v14 = vld [vmem:[#allocation4 + $0x8] sm:$0xff]   ;;  %v467_v15 = vld [vmem:[#allocation4 + $0x10] sm:$0xff]  }
  0x2a   :  { %v468_v16 = vld [vmem:[#allocation4 + $0x18] sm:$0xff]   ;;  %v358_v17 = vld [vmem:[%s644_s2] ss:$0 sm:$0xff]  ;;  %v470_v26 = vld [vmem:[#allocation4 + $0x28] sm:$0xff]  }
  0x2b   :  { %v469_v25 = vld [vmem:[#allocation4 + $0x20] sm:$0xff]   ;;  %v471_v27 = vld [vmem:[#allocation4 + $0x30] sm:$0xff]   ;;  %v472_v28 = vld [vmem:[#allocation4 + $0x38] sm:$0xff]  }
  0x2c   :  { %404 = vmatpush3.bf16.msra.mxu0 %v456_v2  ;;  %412 = vmatpush3.bf16.msra.mxu1 %v458_v6  ;;  %v362_v29 = vld [vmem:[%s646_s4] ss:$0 sm:$0xff] }
  0x2d   :  { %429 = vmatprep.subr.bf16.mxu0 %v531_v0  ;;  %413 = vmatprep.subr.bf16.mxu1 %v531_v0  ;;  %v371_v37 = vld [vmem:[%s648_s6] ss:$0 sm:$0xff] }
  0x2f   :  { %406 = vmatmul.mubr.msk.bf16.vlgmr.msra.gmra.mrb[0].mxu0 %vm80_vm1, %v56_v5 }
  0x30   :  { %445 = vmatprep.mubr.msk.bf16.mxu0 %vm532_vm0, %v531_v0  ;;  %414 = vmatpush3.bf16.msra.mxu1 %v459_v7 }
  0x31   :  { %415 = vmatprep.subr.bf16.mxu1 %v531_v0  ;;  %430 = vmatpush3.bf16.msra.mxu0 %v465_v13 }
  0x32   :  { %431 = vmatprep.subr.bf16.mxu0 %v531_v0 }
  0x34   :  { %416 = vmatpush3.bf16.msra.mxu1 %v460_v8 }
  0x35   :  { %417 = vmatprep.subr.bf16.mxu1 %v531_v0  ;;  %432 = vmatpush3.bf16.msra.mxu0 %v466_v14 }
  0x36   :  { %433 = vmatprep.subr.bf16.mxu0 %v531_v0 }
  0x38   :  { %418 = vmatpush3.bf16.msra.mxu1 %v461_v9 }
  0x39   :  { %419 = vmatprep.subr.bf16.mxu1 %v531_v0  ;;  %434 = vmatpush3.bf16.msra.mxu0 %v467_v15 }
  0x3a   :  { %435 = vmatprep.subr.bf16.mxu0 %v531_v0 }
  0x3c   :  { %420 = vmatpush3.bf16.msra.mxu1 %v462_v10 }
  0x3d   :  { %421 = vmatprep.subr.bf16.mxu1 %v531_v0  ;;  %436 = vmatpush3.bf16.msra.mxu0 %v468_v16 }
  0x3e   :  { %437 = vmatprep.subr.bf16.mxu0 %v531_v0 }
  0x40   :  { %422 = vmatpush3.bf16.msra.mxu1 %v463_v11 }
  0x41   :  { %423 = vmatprep.subr.bf16.mxu1 %v531_v0  ;;  %438 = vmatpush3.bf16.msra.mxu0 %v469_v25 }
  0x42   :  { %439 = vmatprep.subr.bf16.mxu0 %v531_v0 }
  0x44   :  { %424 = vmatpush3.bf16.msra.mxu1 %v464_v12 }
  0x45   :  { %440 = vmatpush3.bf16.msra.mxu0 %v470_v26 }
  0x46   :  { %441 = vmatprep.subr.bf16.mxu0 %v531_v0 }
  0x49   :  { %442 = vmatpush3.bf16.msra.mxu0 %v471_v27 }
  0x4a   :  { %443 = vmatprep.subr.bf16.mxu0 %v531_v0 }
  0x4d   :  { %444 = vmatpush3.bf16.msra.mxu0 %v472_v28 }
 0x102   :  { %v118_v18 = vpop.f32.mrb[0].mxu0 }
 0x103   :  { %v119_v19 = vadd.f32 %v358_v17, %v118_v18  ;;  %v407_v20 = vpop.f32.mrb[1].mxu0 }
 0x104   :  { %v121_v21 = vpop.f32.mrb[2].mxu0 }
 0x105   :  { %473 = vtanh.f32 %v119_v19  ;;  %v408_v22 = vpop.f32.mrb[3].mxu0 }
 0x10f   :  { %v474_v23 = vpop.eup %473 }
 0x110   :  { %v125_v24 = vpack.c.bf16 %v474_v23, %v474_v23 }
 0x112   :  { %426 = vmatmul.mubr.bf16.vlgmr.msra.gmra.mrb[0].mxu1 %v125_v24 }
 0x1e5   :  { %v231_v30 = vpop.f32.mrb[0].mxu1 }
 0x1e6   :  { %v232_v31 = vadd.f32 %v362_v29, %v231_v30  ;;  %v427_v32 = vpop.f32.mrb[1].mxu1 }
 0x1e7   :  { %v234_v33 = vpop.f32.mrb[2].mxu1 }
 0x1e8   :  { %475 = vtanh.f32 %v232_v31  ;;  %v428_v34 = vpop.f32.mrb[3].mxu1 }
 0x1f2   :  { %v476_v35 = vpop.eup %475 }
 0x1f3   :  { %v238_v36 = vpack.c.bf16 %v476_v35, %v476_v35 }
 0x1f5   :  { %446 = vmatmul.mubr.bf16.vlgmr.msra.gmra.mrb[4].mxu0 %v238_v36 }
 0x2c8   :  { %v344_v38 = vpop.f32.mrb[4].mxu0 }
 0x2c9   :  { %v345_v39 = vadd.f32 %v371_v37, %v344_v38  ;;  %v447_v40 = vpop.f32.mrb[5].mxu0 }
 0x2ca   :  { %v347_v41 = vpop.f32.mrb[6].mxu0 }
 0x2cb   :  { %477 = vtanh.f32 %v345_v39  ;;  %v448_v42 = vpop.f32.mrb[7].mxu0 }
 0x2d5   :  { %v478_v43 = vpop.eup %477 }
 0x2d6   :  { %351 = vst [vmem:[%s649_s7] sm:$0xff] %v478_v43 }
 0x2d7   :  { %356 = vsyncpa [#allocation3], 1 }
 0x2d8   :  { %357 = vsyncpa [#allocation5], 1 }

</bundles_post_ra>
